<compile_context>
chip_gen: v7x
topology: tpu7x:2x2x1
jax: 0.10.0
libtpu: 0.0.40
codegen_flags: <defaults>
</compile_context>

<pallas_src>
import jax
import jax.numpy as jnp
from jax.experimental import pallas as pl
from jax.experimental.pallas import tpu as pltpu


_LANE = 128
_TARGET_TILE_BYTES = 2 * 1024 * 1024  # ~2 MiB/block -> ~8 MiB double-buffered in+out


def _sublane(dtype) -> int:
    """Sublane packing for the second-to-last dim (8 f32 / 16 bf16 / 32 int8)."""
    return max(8, 32 // jnp.dtype(dtype).itemsize)


def _pick_aligned_tile(dim: int, align: int, cap: int) -> int:
    """Largest multiple of `align` that divides `dim` and is <= cap.

    Falls back to the full extent when `dim` is not `align`-aligned (legal,
    since a block dim equal to the full array dim needs no (8,128) alignment).
    """
    if dim % align != 0:
        # TODO(synk): for large unaligned dims, tile with a ragged (masked)
        # tail block instead of a single full-extent block.
        return dim
    t = min(dim, max(align, (cap // align) * align))
    while dim % t != 0:
        t -= align
    return t


def _pick_leading_tile(dim: int, cap: int) -> int:
    """Largest divisor of `dim` that is <= cap (leading dim: no alignment rule)."""
    t = max(1, min(dim, cap))
    while dim % t != 0:
        t -= 1
    return t


# ---------------------------------------------------------------------------
# Kernels
# ---------------------------------------------------------------------------

def _layerscale_cf_kernel(scale_ref, x_ref, o_ref):
    # scale_ref: (1, tC, 1) f32   x_ref / o_ref: (1, tC, tT)
    x = x_ref[...]
    o_ref[...] = (x.astype(jnp.float32) * scale_ref[...]).astype(o_ref.dtype)


def _layerscale_cl_kernel(scale_ref, x_ref, o_ref):
    # scale_ref: (1, 1, C) f32    x_ref / o_ref: (tT, B, C)
    x = x_ref[...]
    o_ref[...] = (x.astype(jnp.float32) * scale_ref[...]).astype(o_ref.dtype)


# ---------------------------------------------------------------------------
# Wrappers
# ---------------------------------------------------------------------------

def _layer_scale_channel_first(x: jax.Array, scale: jax.Array) -> jax.Array:
    B, C, T = x.shape
    itemsize = jnp.dtype(x.dtype).itemsize
    sub = _sublane(x.dtype)

    # Lane (T) tile: large multiple of 128 for unmasked, lane-dense stores.
    tT = _pick_aligned_tile(T, _LANE, min(T, 2048))
    # Sublane (C) tile: keep block bytes within the VMEM budget.
    c_cap = max(sub, _TARGET_TILE_BYTES // max(tT * itemsize, 1))
    tC = _pick_aligned_tile(C, sub, c_cap)

    grid = (B, C // tC, T // tT)
    scale_b = scale.reshape(1, C, 1).astype(jnp.float32)

    cost = pl.CostEstimate(
        flops=B * C * T,
        transcendentals=0,
        bytes_accessed=2 * x.size * itemsize + scale_b.size * 4,
    )

    return pl.pallas_call(
        _layerscale_cf_kernel,
        out_shape=jax.ShapeDtypeStruct((B, C, T), x.dtype),
        grid_spec=pltpu.PrefetchScalarGridSpec(
            num_scalar_prefetch=0,
            grid=grid,
            in_specs=[
                # scale stays resident in VMEM; only follows the C-tile index.
                pl.BlockSpec((1, tC, 1), lambda b, ci, ti: (0, ci, 0)),
                pl.BlockSpec((1, tC, tT), lambda b, ci, ti: (b, ci, ti)),
            ],
            out_specs=pl.BlockSpec((1, tC, tT), lambda b, ci, ti: (b, ci, ti)),
        ),
        compiler_params=pltpu.CompilerParams(
            dimension_semantics=("parallel", "parallel", "parallel"),
        ),
        cost_estimate=cost,
    )(scale_b, x)


def _layer_scale_channel_last(x: jax.Array, scale: jax.Array) -> jax.Array:
    # x: (T, B, C) — C is already the lane axis; no transposes needed.
    T, B, C = x.shape
    itemsize = jnp.dtype(x.dtype).itemsize

    row_bytes = max(B * C * itemsize, 1)
    tT = _pick_leading_tile(T, max(1, _TARGET_TILE_BYTES // row_bytes))
    grid = (T // tT,)

    scale_b = scale.reshape(1, 1, C).astype(jnp.float32)

    cost = pl.CostEstimate(
        flops=T * B * C,
        transcendentals=0,
        bytes_accessed=2 * x.size * itemsize + scale_b.size * 4,
    )

    return pl.pallas_call(
        _layerscale_cl_kernel,
        out_shape=jax.ShapeDtypeStruct((T, B, C), x.dtype),
        grid_spec=pltpu.PrefetchScalarGridSpec(
            num_scalar_prefetch=0,
            grid=grid,
            in_specs=[
                pl.BlockSpec((1, 1, C), lambda t: (0, 0, 0)),     # resident scale
                pl.BlockSpec((tT, B, C), lambda t: (t, 0, 0)),    # x tile over T
            ],
            out_specs=pl.BlockSpec((tT, B, C), lambda t: (t, 0, 0)),
        ),
        compiler_params=pltpu.CompilerParams(
            dimension_semantics=("parallel",),
        ),
        cost_estimate=cost,
    )(scale_b, x)


def layer_scale(x: jax.Array, scale: jax.Array, channel_last: bool = False) -> jax.Array:
    """LayerScale forward.

    channel_last=False: x is (B, C, T), out = scale[:, None] * x
    channel_last=True : x is (T, B, C), out = scale * x
    """
    if channel_last:
        return _layer_scale_channel_last(x, scale)
    return _layer_scale_channel_first(x, scale)


if __name__ == "__main__":
    # Deterministic parameter init per the module: scale = full(channels, init).
    B, C, T = 2, 4, 16
    init = 0.1  # module default is 0; use a non-zero value so outputs are non-trivial
    scale = jnp.full((C,), init, dtype=jnp.float32)

    key = jax.random.PRNGKey(0)
    x_cf = jax.random.normal(key, (B, C, T), dtype=jnp.float32)

    # channel_last=False path: (B, C, T)
    out_cf = jax.block_until_ready(layer_scale(x_cf, scale, channel_last=False))
    ref_cf = scale[:, None] * x_cf
    assert out_cf.shape == x_cf.shape and out_cf.dtype == x_cf.dtype
    assert jnp.allclose(out_cf, ref_cf, atol=1e-6), "channel-first mismatch vs reference"

    # channel_last=True path: (T, B, C) — dedicated kernel, no transposes.
    x_cl = jnp.transpose(x_cf, (2, 0, 1))
    out_cl = jax.block_until_ready(layer_scale(x_cl, scale, channel_last=True))
    ref_cl = scale * x_cl
    assert out_cl.shape == x_cl.shape and out_cl.dtype == x_cl.dtype
    assert jnp.allclose(out_cl, ref_cl, atol=1e-6), "channel-last mismatch vs reference"

    print("KERNEL_OK")
</pallas_src>

<mosaic_0001>
module attributes {stable_mosaic.version = 11 : i64} {
  func.func @_layerscale_cf_kernel(%arg0: i32, %arg1: i32, %arg2: i32, %arg3: memref<1x4x1xf32, #tpu.memory_space<vmem>>, %arg4: memref<1x4x16xf32, #tpu.memory_space<vmem>>, %arg5: memref<1x4x16xf32, #tpu.memory_space<vmem>>) attributes {dimension_semantics = [#tpu.dimension_semantics<parallel>, #tpu.dimension_semantics<parallel>, #tpu.dimension_semantics<parallel>], iteration_bounds = array<i64: 2, 1, 1>, scalar_prefetch = 0 : i64, scratch_operands = 0 : i64, tpu.core_type = #tpu.core_type<tc>, window_params = [{transform_indices = @transform_0, window_bounds = array<i64: 1, 4, 1>}, {transform_indices = @transform_1, window_bounds = array<i64: 1, 4, 16>}, {transform_indices = @transform_2, window_bounds = array<i64: 1, 4, 16>}]} {
    %c0 = arith.constant 0 : index
    %c0_0 = arith.constant 0 : index
    %c0_1 = arith.constant 0 : index
    %0 = vector.load %arg4[%c0, %c0_0, %c0_1] : memref<1x4x16xf32, #tpu.memory_space<vmem>>, vector<1x4x16xf32>
    %c0_2 = arith.constant 0 : index
    %c0_3 = arith.constant 0 : index
    %c0_4 = arith.constant 0 : index
    %1 = vector.load %arg3[%c0_2, %c0_3, %c0_4] : memref<1x4x1xf32, #tpu.memory_space<vmem>>, vector<1x4x1xf32>
    %2 = vector.broadcast %1 : vector<1x4x1xf32> to vector<1x4x16xf32>
    %3 = arith.mulf %0, %2 : vector<1x4x16xf32>
    %c0_5 = arith.constant 0 : index
    %c0_6 = arith.constant 0 : index
    %c0_7 = arith.constant 0 : index
    %4 = vector.load %arg5[%c0_5, %c0_6, %c0_7] : memref<1x4x16xf32, #tpu.memory_space<vmem>>, vector<1x4x16xf32>
    tpu.vector_store %arg5[%c0_5, %c0_6, %c0_7], %3 {strides = array<i32>} : memref<1x4x16xf32, #tpu.memory_space<vmem>>, vector<1x4x16xf32>,
    return
  }
  func.func @transform_0(%arg0: i32, %arg1: i32, %arg2: i32) -> (i32, i32, i32) {
    %c0_i32 = arith.constant 0 : i32
    %c0_i32_0 = arith.constant 0 : i32
    %c0_i32_1 = arith.constant 0 : i32
    return %c0_i32, %arg1, %c0_i32_0 : i32, i32, i32
  }
  func.func @transform_1(%arg0: i32, %arg1: i32, %arg2: i32) -> (i32, i32, i32) {
    %c0_i32 = arith.constant 0 : i32
    return %arg0, %arg1, %arg2 : i32, i32, i32
  }
  func.func @transform_2(%arg0: i32, %arg1: i32, %arg2: i32) -> (i32, i32, i32) {
    %c0_i32 = arith.constant 0 : i32
    return %arg0, %arg1, %arg2 : i32, i32, i32
  }
}

</mosaic_0001>

<bundles_post_ra>
// kernel: tpu_custom_call.1
= control target key start
LH: loop header
LB: loop body
LE: loop exit
PB: predicated region body
PF: predicated region fallthrough
CT: control target
= control target key end

     0   :  { %7 = vsyncpa [#allocation3], 0  ;;  %s601_s0 = inlined_call_operand.vmem [shape: f32[1,4,1], index: 0, kind: input, shape index: {}]   ;;  %s602_s1 = inlined_call_operand.vmem [shape: f32[2,4,16], index: 1, kind: input, shape index: {}]   ;;  %s603_s2 = inlined_call_operand.hbm [shape: f32[2,4,16], index: 2, kind: output, shape index: {}]  }
   0x1   :  { %9 = vsyncpa [#allocation3 + $0x1], 0  ;;  %s486_s9 = smov 0   ;;  %s488_s10 = smov 0  }
   0x2   :  { %s490_s11 = smov 0   ;;  %s492_s12 = smov 0  }
   0x3   :  { %s494_s13 = smov 0   ;;  %s496_s14 = smov 0  }
   0x4 LB: > { %s320_s15 = sadd.s32 4294967295, %s467_s14   ;;  %s321_s16 = sadd.s32 4294967294, %s467_s14   ;;  %s467_s14 = sphi %s496_s14, %s15_s14   ;;  %s463_s13 = sphi %s494_s13, %s610_s13   ;;  %s459_s12 = sphi %s492_s12, %s609_s12   ;;  %s455_s11 = sphi %s490_s11, %s608_s11   ;;  %s451_s10 = sphi %s488_s10, %s607_s10   ;;  %s447_s9 = sphi %s486_s9, %s606_s9  }
   0x5   : > { %s34_s17 = sadd.s32 1, %s463_s13  ;;  %s101_s18 = sadd.s32 1, %s455_s11 }
   0x6   : > { %p36_p0 = scmp.ge.s32.totalorder %s34_s17, 2  ;;  %p111_p1 = scmp.ne.s32.totalorder %s455_s11, %s451_s10 }
   0x7   : > { %p112_p2 = scmp.eq.s32.totalorder %s320_s15, 1  ;;  %p117_p3 = scmp.ne.s32.totalorder %s451_s10, %s447_s9 }
   0x8   : > { %s612_s17 = smov (%p36_p0, %s34_s17), 0  ;;  %p118_p5 = scmp.eq.s32.totalorder %s321_s16, 1 }
   0x9   : > { %p526_p4 = por %p112_p2, %p111_p1  ;;  %s94_s20 = ssub.s32 %s463_s13, %s612_s17 }
   0xa   : > { %p325_p6 = scmp.ge.s32.totalorder %s467_s14, 1  ;;  %p99_p7 = scmp.eq.s32.totalorder %s94_s20, 0 }
   0xb   : > { %p533_p8 = por %p118_p5, %p117_p3  ;;  %p156_p9 = scmp.lt.s32.totalorder %s467_s14, 3 }
   0xc   : > { %s539_s22 = scalar_select %p99_p7, %s455_s11, %s101_s18  }
   0xd   : > { %p157_p10 = pnand %p325_p6, %p156_p9 }
   0xe   : > { %v202_v0 = vld [vmem:[%s601_s0] sm:$0xf] (!%p157_p10)  ;;  %v469_v1 = vmov (!%p157_p10), 0   ;;  %p191_p11 = scmp.lt.s32.totalorder (!%p157_p10), %s459_s12, 1  ;;  %s184_s26 = sand.u32 (!%p157_p10), 1, %s451_s10   ;;  %vm209_vm0 = vcmask (!%p157_p10), 125952  }
   0xf   : > { %160 = sbr.rel (%p157_p10) target bundleno = 160 (0xa0), region = 28  ;;  %388 = vset.pattern.permute.xlu0 (!%p157_p10), %v469_v1  ;;  %s326_s28 = sshll.u32 (!%p157_p10), %s184_s26, 2 }
  0x10   : > { %205 = vperm.xlu0 (!%p157_p10), %388, %v202_v0   ;;  %s329_s4 = sshll.u32 (!%p157_p10), %s459_s12, 6  ;;  %s186_s5 = scalar_lea.vmem (!%p157_p10), [#allocation2], %s326_s28 }
  0x11   : > { %s227_s6 = sshll.u32 (!%p157_p10), %s186_s5, 4  ;;  %s554_s15 = scalar_lea.hbm (!%p157_p10), %s603_s2, %s329_s4  ;;  %s556_s6 = int_to_ptr.vmem [resolvable:$true] %s227_s6 }
  0x12   : > { %s212_s16 = scalar_lea.sflag (!%p157_p10), [#allocation3], %s184_s26  ;;  %s389_s18 = scalar_lea.vmem (!%p157_p10), %s556_s6, 64 }
  0x13   : > { %p390_p12 = scmp.ne.s32.totalorder (!%p157_p10), %s556_s6, %s389_s18 }
  0x15   : > { %p391_p13 = pnand (!%p157_p10), %p390_p12, %p526_p4 }
  0x16   : > { %s192_s25 = scalar_select %p191_p11, %s459_s12, 1 }
  0x17   : > { %p392_p0 = pneg %p391_p13  ;;  %s470_s12 = smov [#allocation2]  }
  0x18   : > { %s327_s27 = sshll.u32 %s192_s25, 2  ;;  %s393_s20 = sshll.u32 %s470_s12, 4  ;;  %s394_s20 = int_to_ptr.vmem [resolvable:$false] %s393_s20 }
  0x19   : > { %s200_s3 = scalar_lea.vmem %s602_s1, %s327_s27  ;;  %s395_s23 = scalar_lea.vmem %s394_s20, 128 }
  0x1a   : > { %v201_v2 = vld [vmem:[%s200_s3] sm:$0xf]  ;;  %p396_p1 = scmp.lt.s32.totalorder %s556_s6, %s394_s20  ;;  %p397_p2 = scmp.lt.s32.totalorder %s395_s23, %s389_s18 }
  0x1c   : > { %p398_p3 = por %p397_p2, %p396_p1 }
  0x1e   : > { %p399_p5 = pnand %p398_p3, %p392_p0 }
  0x8f   : > { %v206_v3 = vpop.permute.xlu0 %205 }
  0x90   : > { %v208_v4 = vmul.f32 %v206_v3, %v201_v2 }
  0x92   : > { %210 = vst.msk [vmem:[%s186_s5] sm:$0xf] %vm209_vm0, %v208_v4 }
  0x93   : > { %402 = shalt.err (!%p399_p5)
}
  0x94   : > { %s403_s24 = scalar_lea.hbm %s554_s15, 64  ;;  %s407_s27 = scalar_lea.hbm %s603_s2, 128 }
  0x95   : > { %p404_p6 = scmp.ne.s32.totalorder %s554_s15, %s403_s24  ;;  %p408_p10 = scmp.lt.u32.totalorder %s554_s15, %s603_s2 }
  0x96   : > { %p409_p11 = scmp.lt.u32.totalorder %s407_s27, %s403_s24  ;;  %p411_p13 = scmp.lt.u32.totalorder %s403_s24, %s554_s15 }
  0x97   : > { %p405_p7 = pnand %p404_p6, %p526_p4 }
  0x98   : > { %p410_p12 = por %p409_p11, %p408_p10 }
  0x99   : > { %p406_p9 = pneg %p405_p7 }
  0x9a   : > { %p412_p0 = por %p411_p13, %p410_p12 }
  0x9c   : > { %p413_p1 = pnand %p412_p0, %p406_p9 }
  0x9e   : > { %416 = shalt.err (!%p413_p1)
}
  0x9f   : > { %332 = dma.vmem_to_hbm [thread:$0]  (%p526_p4), %s556_s6, 64, %s554_s15, %s212_s16  }
  0xa0 PF: > { %p338_p2 = scmp.ge.s32.totalorder %s467_s14, 2  ;;  %s239_s30 = sand.u32 1, %s447_s9  }
  0xa1   : > { %s240_s3 = scalar_lea.sflag [#allocation3], %s239_s30 }
  0xa2   : > { %p335_p3 = pnand %p338_p2, %p533_p8 }
  0xa4   : > { %442 = dma.done.wait (!%p335_p3), %s240_s3, 64  }
  0xa5   : > { %444 = vsyncadd (!%p335_p3), %s240_s3, 4294967232  ;;  %s15_s14 = sadd.s32 1, %s467_s14   ;;  %s606_s9 = smov %s451_s10 }
  0xa6   : > { %p12_p5 = scmp.ge.s32.totalorder %s15_s14, 4   ;;  %s607_s10 = smov %s455_s11 }
  0xa7   : > { %s608_s11 = smov %s539_s22  ;;  %s609_s12 = smov %s463_s13 }
  0xa8   : > { %s610_s13 = smov %s612_s17  ;;  %14 = sbr.rel (!%p12_p5) target bundleno = 4 (0x4), region = 66 }
  0xaf   :  { %245 = vsyncpa [#allocation3], 1 }
  0xb0   :  { %247 = vsyncpa [#allocation3 + $0x1], 1 }

</bundles_post_ra>
